<compile_context>
chip_gen: v7x
topology: tpu7x:2x2x1
jax: 0.10.0
libtpu: 0.0.40
codegen_flags: <defaults>
</compile_context>

<pallas_src>
import functools

import jax
import jax.numpy as jnp
from jax import lax
from jax.experimental import pallas as pl
from jax.experimental.pallas import tpu as pltpu


def _make_resblock_kernel(H, W, C, K, Wp, res_scale):
    """Build the fused residual-block kernel for static shapes.

    Wide-flat coordinate system: output position j = y*Wp + xw with y in [0,H),
    xw in [0,Wp).  Columns xw >= W are garbage and are masked / discarded; for
    valid columns, the tap slice starting at ky*Wp + kx of the flattened padded
    input reads exactly xpad[:, y+ky, xw+kx].
    """
    p = K // 2
    L = H * Wp                    # wide-flat spatial length
    halo = p * Wp + p             # zero halo needed on each side for conv2
    starts = [ky * Wp + kx for ky in range(K) for kx in range(K)]
    center = p * Wp + p           # center-tap offset == original (unpadded) x

    def kernel(xf_ref, w1_ref, b1_ref, w2_ref, b2_ref, mask_ref, out_ref):
        # xf_ref:  (1, C, L + 2*halo) f32 flattened zero-padded input image
        # w*_ref:  (C, K*K*C)         bf16 im2col weights (Cout x taps*Cin)
        # b*_ref:  (C, 1)             f32
        # mask_ref:(1, L)             f32 validity mask (column < W)
        # out_ref: (1, C, L)          output in the wide-flat layout
        xf = xf_ref[0]                                   # (C, L + 2*halo) f32
        xf_bf = xf.astype(jnp.bfloat16)

        # ---------------- conv1 (+bias) + ReLU ----------------
        # im2col patch matrix: (K*K*C, L), one bf16 matmul, f32 accumulate.
        p1 = jnp.concatenate([xf_bf[:, s:s + L] for s in starts], axis=0)
        h = jnp.dot(w1_ref[...], p1, preferred_element_type=jnp.float32)
        h = jnp.maximum(h + b1_ref[...], 0.0)
        # Zero the garbage columns so they act as conv2's horizontal padding.
        h = h * mask_ref[...]                            # (C, L) f32

        # ---------------- conv2 (+bias) ----------------
        # Value-level zero halo (top/bottom padding); no scratch round trip.
        zhalo = jnp.zeros((C, halo), jnp.bfloat16)
        hp = jnp.concatenate([zhalo, h.astype(jnp.bfloat16), zhalo], axis=1)
        p2 = jnp.concatenate([hp[:, s:s + L] for s in starts], axis=0)
        r = jnp.dot(w2_ref[...], p2, preferred_element_type=jnp.float32)
        r = r + b2_ref[...]

        # ---------------- scale + residual add (fused epilogue) --------------
        # Residual = center-tap slice of the padded input (== original x), f32.
        x_res = xf[:, center:center + L]
        out_ref[0] = (r * res_scale + x_res).astype(out_ref.dtype)

    return kernel


def s_resblock(x_nchw, w1, b1, w2, b2, *, res_scale=1.0):
    """Pallas S_ResBlock forward.

    x_nchw: (B, C, H, W) float32 (torch layout)
    w1, w2: (C, C, K, K) float32 (torch OIHW layout), b1, b2: (C,)
    returns (B, C, H, W)
    """
    B, C, H, W = x_nchw.shape
    Cout, Cin, K, K2 = w1.shape
    assert Cout == C and Cin == C and K == K2 and K % 2 == 1
    p = K // 2
    Hp, Wp = H + 2 * p, W + 2 * p
    L = H * Wp
    halo = p * Wp + p
    Lx = L + 2 * halo            # == Hp*Wp + 2*p

    # Layout plumbing: zero-pad spatially, flatten rows into the lane dim
    # (channels stay on sublanes => no NCHW transpose needed), then append 2*p
    # trailing zeros so the last tap slice stays in bounds.
    xpad = jnp.pad(x_nchw, ((0, 0), (0, 0), (p, p), (p, p)))      # (B,C,Hp,Wp)
    xflat = xpad.reshape(B, C, Hp * Wp)
    xflat = jnp.pad(xflat, ((0, 0), (0, 0), (0, 2 * p)))          # (B,C,Lx)

    # im2col weights (Cout, K*K*Cin): [co, (ky*K+kx)*C + ci] = w[co,ci,ky,kx].
    # Shipped as bf16 MXU operands; accumulation stays f32 in-kernel.
    w1m = jnp.transpose(w1, (0, 2, 3, 1)).reshape(C, K * K * C).astype(jnp.bfloat16)
    w2m = jnp.transpose(w2, (0, 2, 3, 1)).reshape(C, K * K * C).astype(jnp.bfloat16)
    b1m = b1.reshape(C, 1).astype(jnp.float32)
    b2m = b2.reshape(C, 1).astype(jnp.float32)

    # Lane-validity mask over the wide (H, Wp) grid: column index < W.
    col = jnp.arange(L, dtype=jnp.int32) % Wp
    mask = (col < W).astype(jnp.float32).reshape(1, L)

    kernel = _make_resblock_kernel(H, W, C, K, Wp, float(res_scale))

    out_wide = pl.pallas_call(
        kernel,
        out_shape=jax.ShapeDtypeStruct((B, C, L), x_nchw.dtype),
        grid_spec=pltpu.PrefetchScalarGridSpec(
            num_scalar_prefetch=0,
            grid=(B,),
            in_specs=[
                pl.BlockSpec((1, C, Lx), lambda b: (b, 0, 0)),
                pl.BlockSpec((C, K * K * C), lambda b: (0, 0)),
                pl.BlockSpec((C, 1), lambda b: (0, 0)),
                pl.BlockSpec((C, K * K * C), lambda b: (0, 0)),
                pl.BlockSpec((C, 1), lambda b: (0, 0)),
                pl.BlockSpec((1, L), lambda b: (0, 0)),
            ],
            out_specs=pl.BlockSpec((1, C, L), lambda b: (b, 0, 0)),
        ),
        compiler_params=pltpu.CompilerParams(
            dimension_semantics=("parallel",)),
    )(xflat, w1m, b1m, w2m, b2m, mask)

    # Drop the Wp-W garbage columns of the wide layout (cheap wrapper slice).
    return out_wide.reshape(B, C, H, Wp)[:, :, :, :W]


if __name__ == "__main__":
    # Small shapes consistent with the module: batch=2, n_feats=32, 16x16, k=3.
    B, C, H, W = 2, 32, 16, 16
    K = 3
    res_scale = 1.0

    key = jax.random.PRNGKey(0)
    kx_, kw1, kb1, kw2, kb2 = jax.random.split(key, 5)
    fan = C * K * K
    x = jax.random.normal(kx_, (B, C, H, W), dtype=jnp.float32)
    w1 = jax.random.normal(kw1, (C, C, K, K), dtype=jnp.float32) / jnp.sqrt(fan)
    b1 = jax.random.normal(kb1, (C,), dtype=jnp.float32) * 0.01
    w2 = jax.random.normal(kw2, (C, C, K, K), dtype=jnp.float32) / jnp.sqrt(fan)
    b2 = jax.random.normal(kb2, (C,), dtype=jnp.float32) * 0.01

    fn = jax.jit(functools.partial(s_resblock, res_scale=res_scale))
    out = fn(x, w1, b1, w2, b2)
    out = jax.block_until_ready(out)

    # Reference: plain-JAX convs (same-padded, cross-correlation, like torch).
    dn = lax.conv_dimension_numbers(x.shape, w1.shape, ('NCHW', 'OIHW', 'NCHW'))
    h_ref = lax.conv_general_dilated(x, w1, (1, 1), 'SAME', dimension_numbers=dn)
    h_ref = jnp.maximum(h_ref + b1[None, :, None, None], 0.0)
    h_ref = lax.conv_general_dilated(h_ref, w2, (1, 1), 'SAME', dimension_numbers=dn)
    ref = (h_ref + b2[None, :, None, None]) * res_scale + x

    assert out.shape == x.shape, out.shape
    max_err = float(jnp.max(jnp.abs(out - ref)))
    # Loose tolerance: the kernel uses bf16 MXU operands (f32 accumulation) per
    # the perf review, and XLA's conv precision also differs from exact f32;
    # structural bugs would show O(1) errors.
    assert jnp.allclose(out, ref, atol=5e-2, rtol=5e-2), f"max err {max_err}"
    print("KERNEL_OK")
</pallas_src>

<mosaic_0001>
module attributes {stable_mosaic.version = 11 : i64} {
  func.func @kernel(%arg0: i32, %arg1: memref<1x32x326xf32, #tpu.memory_space<vmem>>, %arg2: memref<32x288xbf16, #tpu.memory_space<vmem>>, %arg3: memref<32x1xf32, #tpu.memory_space<vmem>>, %arg4: memref<32x288xbf16, #tpu.memory_space<vmem>>, %arg5: memref<32x1xf32, #tpu.memory_space<vmem>>, %arg6: memref<1x288xf32, #tpu.memory_space<vmem>>, %arg7: memref<1x32x288xf32, #tpu.memory_space<vmem>>) attributes {dimension_semantics = [#tpu.dimension_semantics<parallel>], iteration_bounds = array<i64: 2>, scalar_prefetch = 0 : i64, scratch_operands = 0 : i64, tpu.core_type = #tpu.core_type<tc>, window_params = [{transform_indices = @transform_0, window_bounds = array<i64: 1, 32, 326>}, {pipeline_mode = #tpu.pipeline_mode<synchronous>, transform_indices = @transform_1, window_bounds = array<i64: 32, 288>}, {pipeline_mode = #tpu.pipeline_mode<synchronous>, transform_indices = @transform_2, window_bounds = array<i64: 32, 1>}, {pipeline_mode = #tpu.pipeline_mode<synchronous>, transform_indices = @transform_3, window_bounds = array<i64: 32, 288>}, {pipeline_mode = #tpu.pipeline_mode<synchronous>, transform_indices = @transform_4, window_bounds = array<i64: 32, 1>}, {pipeline_mode = #tpu.pipeline_mode<synchronous>, transform_indices = @transform_5, window_bounds = array<i64: 1, 288>}, {transform_indices = @transform_6, window_bounds = array<i64: 1, 32, 288>}]} {
    %c0 = arith.constant 0 : index
    %c0_0 = arith.constant 0 : index
    %c0_1 = arith.constant 0 : index
    %0 = vector.load %arg1[%c0, %c0_0, %c0_1] : memref<1x32x326xf32, #tpu.memory_space<vmem>>, vector<1x32x326xf32>
    %1 = vector.shape_cast %0 : vector<1x32x326xf32> to vector<32x326xf32>
    %2 = arith.truncf %1 : vector<32x326xf32> to vector<32x326xbf16>
    %3 = vector.extract_strided_slice %2 {offsets = [0, 0], sizes = [32, 288], strides = [1, 1]} : vector<32x326xbf16> to vector<32x288xbf16>
    %4 = vector.extract_strided_slice %2 {offsets = [0, 1], sizes = [32, 288], strides = [1, 1]} : vector<32x326xbf16> to vector<32x288xbf16>
    %5 = vector.extract_strided_slice %2 {offsets = [0, 2], sizes = [32, 288], strides = [1, 1]} : vector<32x326xbf16> to vector<32x288xbf16>
    %6 = vector.extract_strided_slice %2 {offsets = [0, 18], sizes = [32, 288], strides = [1, 1]} : vector<32x326xbf16> to vector<32x288xbf16>
    %7 = vector.extract_strided_slice %2 {offsets = [0, 19], sizes = [32, 288], strides = [1, 1]} : vector<32x326xbf16> to vector<32x288xbf16>
    %8 = vector.extract_strided_slice %2 {offsets = [0, 20], sizes = [32, 288], strides = [1, 1]} : vector<32x326xbf16> to vector<32x288xbf16>
    %9 = vector.extract_strided_slice %2 {offsets = [0, 36], sizes = [32, 288], strides = [1, 1]} : vector<32x326xbf16> to vector<32x288xbf16>
    %10 = vector.extract_strided_slice %2 {offsets = [0, 37], sizes = [32, 288], strides = [1, 1]} : vector<32x326xbf16> to vector<32x288xbf16>
    %11 = vector.extract_strided_slice %2 {offsets = [0, 38], sizes = [32, 288], strides = [1, 1]} : vector<32x326xbf16> to vector<32x288xbf16>
    %12 = tpu.concatenate %3, %4, %5, %6, %7, %8, %9, %10, %11 in 0 : vector<32x288xbf16>, vector<32x288xbf16>, vector<32x288xbf16>, vector<32x288xbf16>, vector<32x288xbf16>, vector<32x288xbf16>, vector<32x288xbf16>, vector<32x288xbf16>, vector<32x288xbf16> -> vector<288x288xbf16>
    %c0_2 = arith.constant 0 : index
    %c0_3 = arith.constant 0 : index
    %13 = vector.load %arg2[%c0_2, %c0_3] : memref<32x288xbf16, #tpu.memory_space<vmem>>, vector<32x288xbf16>
    %cst = arith.constant dense<0.000000e+00> : vector<32x288xf32>
    %14 = tpu.matmul %13, %12, %cst {dimension_numbers = #tpu.dot_dimension_numbers<[1], [0], [0], [1], [0, 0, 1, 1], [], []>} : vector<32x288xbf16>, vector<288x288xbf16>, vector<32x288xf32> -> vector<32x288xf32>
    %c0_4 = arith.constant 0 : index
    %c0_5 = arith.constant 0 : index
    %15 = vector.load %arg3[%c0_4, %c0_5] : memref<32x1xf32, #tpu.memory_space<vmem>>, vector<32x1xf32>
    %16 = vector.broadcast %15 : vector<32x1xf32> to vector<32x288xf32>
    %17 = arith.addf %14, %16 : vector<32x288xf32>
    %cst_6 = arith.constant 0.000000e+00 : f32
    %18 = vector.broadcast %cst_6 : f32 to vector<32x288xf32>
    %19 = arith.maximumf %17, %18 : vector<32x288xf32>
    %c0_7 = arith.constant 0 : index
    %c0_8 = arith.constant 0 : index
    %20 = vector.load %arg6[%c0_7, %c0_8] : memref<1x288xf32, #tpu.memory_space<vmem>>, vector<1x288xf32>
    %21 = vector.broadcast %20 : vector<1x288xf32> to vector<32x288xf32>
    %22 = arith.mulf %19, %21 : vector<32x288xf32>
    %cst_9 = arith.constant 0.000000e+00 : bf16
    %23 = vector.broadcast %cst_9 : bf16 to vector<32x19xbf16>
    %24 = arith.truncf %22 : vector<32x288xf32> to vector<32x288xbf16>
    %25 = tpu.concatenate %23, %24, %23 in 1 : vector<32x19xbf16>, vector<32x288xbf16>, vector<32x19xbf16> -> vector<32x326xbf16>
    %26 = vector.extract_strided_slice %25 {offsets = [0, 0], sizes = [32, 288], strides = [1, 1]} : vector<32x326xbf16> to vector<32x288xbf16>
    %27 = vector.extract_strided_slice %25 {offsets = [0, 1], sizes = [32, 288], strides = [1, 1]} : vector<32x326xbf16> to vector<32x288xbf16>
    %28 = vector.extract_strided_slice %25 {offsets = [0, 2], sizes = [32, 288], strides = [1, 1]} : vector<32x326xbf16> to vector<32x288xbf16>
    %29 = vector.extract_strided_slice %25 {offsets = [0, 18], sizes = [32, 288], strides = [1, 1]} : vector<32x326xbf16> to vector<32x288xbf16>
    %30 = vector.extract_strided_slice %25 {offsets = [0, 19], sizes = [32, 288], strides = [1, 1]} : vector<32x326xbf16> to vector<32x288xbf16>
    %31 = vector.extract_strided_slice %25 {offsets = [0, 20], sizes = [32, 288], strides = [1, 1]} : vector<32x326xbf16> to vector<32x288xbf16>
    %32 = vector.extract_strided_slice %25 {offsets = [0, 36], sizes = [32, 288], strides = [1, 1]} : vector<32x326xbf16> to vector<32x288xbf16>
    %33 = vector.extract_strided_slice %25 {offsets = [0, 37], sizes = [32, 288], strides = [1, 1]} : vector<32x326xbf16> to vector<32x288xbf16>
    %34 = vector.extract_strided_slice %25 {offsets = [0, 38], sizes = [32, 288], strides = [1, 1]} : vector<32x326xbf16> to vector<32x288xbf16>
    %35 = tpu.concatenate %26, %27, %28, %29, %30, %31, %32, %33, %34 in 0 : vector<32x288xbf16>, vector<32x288xbf16>, vector<32x288xbf16>, vector<32x288xbf16>, vector<32x288xbf16>, vector<32x288xbf16>, vector<32x288xbf16>, vector<32x288xbf16>, vector<32x288xbf16> -> vector<288x288xbf16>
    %c0_10 = arith.constant 0 : index
    %c0_11 = arith.constant 0 : index
    %36 = vector.load %arg4[%c0_10, %c0_11] : memref<32x288xbf16, #tpu.memory_space<vmem>>, vector<32x288xbf16>
    %cst_12 = arith.constant dense<0.000000e+00> : vector<32x288xf32>
    %37 = tpu.matmul %36, %35, %cst_12 {dimension_numbers = #tpu.dot_dimension_numbers<[1], [0], [0], [1], [0, 0, 1, 1], [], []>} : vector<32x288xbf16>, vector<288x288xbf16>, vector<32x288xf32> -> vector<32x288xf32>
    %c0_13 = arith.constant 0 : index
    %c0_14 = arith.constant 0 : index
    %38 = vector.load %arg5[%c0_13, %c0_14] : memref<32x1xf32, #tpu.memory_space<vmem>>, vector<32x1xf32>
    %39 = vector.broadcast %38 : vector<32x1xf32> to vector<32x288xf32>
    %40 = arith.addf %37, %39 : vector<32x288xf32>
    %41 = vector.extract_strided_slice %1 {offsets = [0, 19], sizes = [32, 288], strides = [1, 1]} : vector<32x326xf32> to vector<32x288xf32>
    %cst_15 = arith.constant 1.000000e+00 : f32
    %42 = vector.broadcast %cst_15 : f32 to vector<32x288xf32>
    %43 = arith.mulf %40, %42 : vector<32x288xf32>
    %44 = arith.addf %43, %41 : vector<32x288xf32>
    %c0_16 = arith.constant 0 : index
    %c0_17 = arith.constant 0 : index
    %c0_18 = arith.constant 0 : index
    %45 = vector.load %arg7[%c0_16, %c0_17, %c0_18] : memref<1x32x288xf32, #tpu.memory_space<vmem>>, vector<1x32x288xf32>
    %46 = vector.shape_cast %45 : vector<1x32x288xf32> to vector<32x288xf32>
    %47 = vector.shape_cast %44 : vector<32x288xf32> to vector<1x32x288xf32>
    tpu.vector_store %arg7[%c0_16, %c0_17, %c0_18], %47 {strides = array<i32>} : memref<1x32x288xf32, #tpu.memory_space<vmem>>, vector<1x32x288xf32>,
    return
  }
  func.func @transform_0(%arg0: i32) -> (i32, i32, i32) {
    %c0_i32 = arith.constant 0 : i32
    %c0_i32_0 = arith.constant 0 : i32
    %c0_i32_1 = arith.constant 0 : i32
    return %arg0, %c0_i32, %c0_i32_0 : i32, i32, i32
  }
  func.func @transform_1(%arg0: i32) -> (i32, i32) {
    %c0_i32 = arith.constant 0 : i32
    %c0_i32_0 = arith.constant 0 : i32
    %c0_i32_1 = arith.constant 0 : i32
    return %c0_i32, %c0_i32_0 : i32, i32
  }
  func.func @transform_2(%arg0: i32) -> (i32, i32) {
    %c0_i32 = arith.constant 0 : i32
    %c0_i32_0 = arith.constant 0 : i32
    %c0_i32_1 = arith.constant 0 : i32
    return %c0_i32, %c0_i32_0 : i32, i32
  }
  func.func @transform_3(%arg0: i32) -> (i32, i32) {
    %c0_i32 = arith.constant 0 : i32
    %c0_i32_0 = arith.constant 0 : i32
    %c0_i32_1 = arith.constant 0 : i32
    return %c0_i32, %c0_i32_0 : i32, i32
  }
  func.func @transform_4(%arg0: i32) -> (i32, i32) {
    %c0_i32 = arith.constant 0 : i32
    %c0_i32_0 = arith.constant 0 : i32
    %c0_i32_1 = arith.constant 0 : i32
    return %c0_i32, %c0_i32_0 : i32, i32
  }
  func.func @transform_5(%arg0: i32) -> (i32, i32) {
    %c0_i32 = arith.constant 0 : i32
    %c0_i32_0 = arith.constant 0 : i32
    %c0_i32_1 = arith.constant 0 : i32
    return %c0_i32, %c0_i32_0 : i32, i32
  }
  func.func @transform_6(%arg0: i32) -> (i32, i32, i32) {
    %c0_i32 = arith.constant 0 : i32
    %c0_i32_0 = arith.constant 0 : i32
    %c0_i32_1 = arith.constant 0 : i32
    return %arg0, %c0_i32, %c0_i32_0 : i32, i32, i32
  }
}

</mosaic_0001>

<bundles_post_ra>
// kernel: s_resblock.1
= control target key start
LH: loop header
LB: loop body
LE: loop exit
PB: predicated region body
PF: predicated region fallthrough
CT: control target
= control target key end

     0   :  { %s1644_s21 = smov 0   ;;  %s2145_s0 = inlined_call_operand.vmem [shape: f32[2,32,326], index: 0, kind: input, shape index: {}]   ;;  %s2146_s1 = inlined_call_operand.vmem [shape: bf16[32,288], index: 1, kind: input, shape index: {}]   ;;  %s2147_s2 = inlined_call_operand.vmem [shape: f32[32,1], index: 2, kind: input, shape index: {}]   ;;  %s2148_s3 = inlined_call_operand.vmem [shape: bf16[32,288], index: 3, kind: input, shape index: {}]   ;;  %s2149_s4 = inlined_call_operand.vmem [shape: f32[32,1], index: 4, kind: input, shape index: {}]   ;;  %s2150_s5 = inlined_call_operand.vmem [shape: f32[1,288], index: 5, kind: input, shape index: {}]   ;;  %s2151_s6 = inlined_call_operand.vmem [shape: f32[2,32,288], index: 6, kind: output, shape index: {}]  }
   0x1 LB: > { %s1409_s22 = sadd.s32 4294967295, %s1597_s21   ;;  %p1413_p0 = scmp.ge.s32.totalorder %s1597_s21, 1  ;;  %s1597_s21 = sphi %s1644_s21, %s16_s21  }
   0x2   : > { %p212_p1 = scmp.lt.s32.totalorder %s1597_s21, 3 }
   0x4   : > { %p213_p2 = pnand %p1413_p0, %p212_p1 }
   0x5   : > { %p242_p3 = scmp.lt.s32.totalorder (!%p213_p2), %s1409_s22, 1  ;;  %s1599_s27 = smov (!%p213_p2), 127   ;;  %v1577_v18 = vld [vmem:[%s2146_s1 + $0x4] ss:$12 sps:$4 sm:$0xff] (!%p213_p2)   ;;  %v1606_v19 = vmov (!%p213_p2), 0   ;;  %v470_v21 = vld [vmem:[%s2147_s2 + $0x8] sm:$0xff] (!%p213_p2) }
   0x6   : > { %216 = sbr.rel (%p213_p2) target bundleno = 1022 (0x3fe), region = 44  ;;  %s1600_s28 = smov (!%p213_p2), 126   ;;  %668 = vmatprep.mubr.bf16.mxu1 (!%p213_p2), %v1577_v18  ;;  %562 = vmatprep.mubr.bf16.mxu0 (!%p213_p2), %v1577_v18  ;;  %v469_v20 = vld [vmem:[%s2147_s2] sm:$0xff] (!%p213_p2)  ;;  %v472_v22 = vld [vmem:[%s2147_s2 + $0x18] sm:$0xff] (!%p213_p2)  ;;  %v471_v23 = vld [vmem:[%s2147_s2 + $0x10] sm:$0xff] (!%p213_p2)  ;;  %vm289_vm0 = vcmask (!%p213_p2), 1039360  }
   0x7   : > { %s1601_s29 = smov (!%p213_p2), 110   ;;  %s1602_s30 = smov (!%p213_p2), 109   ;;  %1574 = vset.pattern.permute.xlu1 (!%p213_p2), %v1606_v19  ;;  %1573 = vset.pattern.permute.xlu0 (!%p213_p2), %v1606_v19  ;;  %vm312_vm1 = vcmask (!%p213_p2), 1031168   ;;  %vm335_vm2 = vcmask (!%p213_p2), 900096   ;;  %vm358_vm3 = vcmask (!%p213_p2), 891904   ;;  %vm381_vm4 = vcmask (!%p213_p2), 883712  }
   0x8   : > { %s1603_s7 = smov (!%p213_p2), 108   ;;  %s1604_s8 = smov (!%p213_p2), 92   ;;  %vm404_vm5 = vcmask (!%p213_p2), 752640   ;;  %vm427_vm6 = vcmask (!%p213_p2), 744448   ;;  %vm450_vm7 = vcmask (!%p213_p2), 736256   ;;  %vm523_vm8 = vcmask (!%p213_p2), 261120  }
   0x9   : > { %s1605_s11 = smov (!%p213_p2), 91   ;;  %s1607_s12 = smov (!%p213_p2), 90   ;;  %vm799_vm9 = vcmask (!%p213_p2), 154624   ;;  %vm814_vm10 = vcmask (!%p213_p2), 416768  }
   0xa   : > { %s1608_s20 = smov (!%p213_p2), 19   ;;  %vm1902_vm11 = vmneg (!%p213_p2), %vm799_vm9 }
   0xd   : > { %s2155_s22 = smov (!%p242_p3, %s1409_s22), 1 }
   0xe   : > { %s1554_s23 = smul.u32 96, %s2155_s22 }
  0x10   : > { %s246_s26 = scalar_lea.vmem %s2145_s0, %s1554_s23 }
  0x11   : > { %v1660_v0 = vld [vmem:[%s246_s26 + $0x8] sm:$0xff]  ;;  %v1662_v1 = vld [vmem:[%s246_s26 + $0x20] sm:$0xff]  ;;  %v1670_v4 = vld [vmem:[%s246_s26 + $0x18] sm:$0xff] }
  0x12   : > { %v1664_v2 = vld [vmem:[%s246_s26] sm:$0xff]  ;;  %v1668_v3 = vpack.c.bf16 %v1662_v1, %v1660_v0  ;;  %v1672_v5 = vld [vmem:[%s246_s26 + $0x10] sm:$0xff]  ;;  %v1674_v6 = vld [vmem:[%s246_s26 + $0x28] sm:$0xff] }
  0x13   : > { %v1678_v7 = vpack.c.bf16 %v1670_v4, %v1664_v2  ;;  %v1680_v8 = vld [vmem:[%s246_s26 + $0x38] sm:$0xff]  ;;  %v1682_v9 = vld [vmem:[%s246_s26 + $0x50] sm:$0xff]  ;;  %v1688_v10 = vpack.c.bf16 %v1674_v6, %v1672_v5  ;;  %v1696_v13 = vld [vmem:[%s246_s26 + $0x48] sm:$0xff] }
  0x14   : > { %279 = vrot.lane.b32.xlu0 %v1668_v3, %s1599_s27  ;;  %v1692_v11 = vpack.c.bf16 %v1682_v9, %v1680_v8  ;;  %v1694_v12 = vld [vmem:[%s246_s26 + $0x30] sm:$0xff]  ;;  %530 = vmatprep.subr.bf16.mxu0 %v1668_v3  ;;  %v1701_v14 = vld [vmem:[%s246_s26 + $0x40] sm:$0xff]  ;;  %v1703_v15 = vld [vmem:[%s246_s26 + $0x58] sm:$0xff] }
  0x15   : > { %277 = vrot.lane.b32.xlu1 %v1678_v7, %s1599_s27  ;;  %531 = vmatpush1.bf16.msra.mxu0 %v1678_v7  ;;  %v268_v16 = vpack.c.bf16 %v1696_v13, %v1694_v12  ;;  %v1713_v17 = vpack.c.bf16 %v1703_v15, %v1701_v14 }
  0x16   : > { %532 = vmatprep.subr.bf16.mxu0 %v1692_v11 }
  0x18   : > { %281 = vrot.lane.b32.xlu0 %v1688_v10, %s1599_s27 }
  0x19   : > { %285 = vrot.lane.b32.xlu1 %v1692_v11, %s1599_s27  ;;  %533 = vmatpush1.bf16.msra.mxu0 %v268_v16 }
  0x1c   : > { %287 = vrot.lane.b32.xlu0 %v1713_v17, %s1599_s27 }
  0x1d   : > { %283 = vrot.lane.b32.xlu1 %v268_v16, %s1599_s27 }
  0x20   : > { %302 = vrot.lane.b32.xlu0 %v1668_v3, %s1600_s28 }
  0x21   : > { %304 = vrot.lane.b32.xlu1 %v1688_v10, %s1600_s28 }
  0x24   : > { %300 = vrot.lane.b32.xlu0 %v1678_v7, %s1600_s28 }
  0x25   : > { %308 = vrot.lane.b32.xlu1 %v1692_v11, %s1600_s28 }
  0x28   : > { %310 = vrot.lane.b32.xlu0 %v1713_v17, %s1600_s28 }
  0x29   : > { %306 = vrot.lane.b32.xlu1 %v268_v16, %s1600_s28 }
  0x2c   : > { %325 = vrot.lane.b32.xlu0 %v1668_v3, %s1601_s29 }
  0x2d   : > { %327 = vrot.lane.b32.xlu1 %v1688_v10, %s1601_s29 }
  0x30   : > { %323 = vrot.lane.b32.xlu0 %v1678_v7, %s1601_s29 }
  0x31   : > { %331 = vrot.lane.b32.xlu1 %v1692_v11, %s1601_s29 }
  0x34   : > { %333 = vrot.lane.b32.xlu0 %v1713_v17, %s1601_s29 }
  0x35   : > { %329 = vrot.lane.b32.xlu1 %v268_v16, %s1601_s29 }
  0x38   : > { %348 = vrot.lane.b32.xlu0 %v1668_v3, %s1602_s30 }
  0x39   : > { %350 = vrot.lane.b32.xlu1 %v1688_v10, %s1602_s30 }
  0x3c   : > { %346 = vrot.lane.b32.xlu0 %v1678_v7, %s1602_s30 }
  0x3d   : > { %354 = vrot.lane.b32.xlu1 %v1692_v11, %s1602_s30 }
  0x40   : > { %356 = vrot.lane.b32.xlu0 %v1713_v17, %s1602_s30 }
  0x41   : > { %352 = vrot.lane.b32.xlu1 %v268_v16, %s1602_s30 }
  0x44   : > { %371 = vrot.lane.b32.xlu0 %v1668_v3, %s1603_s7 }
  0x45   : > { %373 = vrot.lane.b32.xlu1 %v1688_v10, %s1603_s7 }
  0x48   : > { %369 = vrot.lane.b32.xlu0 %v1678_v7, %s1603_s7 }
  0x49   : > { %377 = vrot.lane.b32.xlu1 %v1692_v11, %s1603_s7 }
  0x4c   : > { %379 = vrot.lane.b32.xlu0 %v1713_v17, %s1603_s7 }
  0x4d   : > { %375 = vrot.lane.b32.xlu1 %v268_v16, %s1603_s7 }
  0x50   : > { %394 = vrot.lane.b32.xlu0 %v1668_v3, %s1604_s8 }
  0x51   : > { %396 = vrot.lane.b32.xlu1 %v1688_v10, %s1604_s8 }
  0x54   : > { %392 = vrot.lane.b32.xlu0 %v1678_v7, %s1604_s8 }
  0x55   : > { %400 = vrot.lane.b32.xlu1 %v1692_v11, %s1604_s8 }
  0x58   : > { %402 = vrot.lane.b32.xlu0 %v1713_v17, %s1604_s8 }
  0x59   : > { %398 = vrot.lane.b32.xlu1 %v268_v16, %s1604_s8 }
  0x5c   : > { %417 = vrot.lane.b32.xlu0 %v1668_v3, %s1605_s11 }
  0x5d   : > { %419 = vrot.lane.b32.xlu1 %v1688_v10, %s1605_s11 }
  0x60   : > { %415 = vrot.lane.b32.xlu0 %v1678_v7, %s1605_s11 }
  0x61   : > { %423 = vrot.lane.b32.xlu1 %v1692_v11, %s1605_s11 }
  0x64   : > { %425 = vrot.lane.b32.xlu0 %v1713_v17, %s1605_s11 }
  0x65   : > { %421 = vrot.lane.b32.xlu1 %v268_v16, %s1605_s11 }
  0x68   : > { %440 = vrot.lane.b32.xlu0 %v1668_v3, %s1607_s12 }
  0x69   : > { %442 = vrot.lane.b32.xlu1 %v1688_v10, %s1607_s12 }
  0x6c   : > { %438 = vrot.lane.b32.xlu0 %v1678_v7, %s1607_s12 }
  0x6d   : > { %446 = vrot.lane.b32.xlu1 %v1692_v11, %s1607_s12 }
  0x70   : > { %448 = vrot.lane.b32.xlu0 %v1713_v17, %s1607_s12 }
  0x71   : > { %444 = vrot.lane.b32.xlu1 %v268_v16, %s1607_s12 }
  0x74   : > { %475 = vperm.xlu0 %1573, %v469_v20  }
  0x75   : > { %480 = vperm.xlu1 %1574, %v470_v21  }
  0x78   : > { %490 = vperm.xlu0 %1573, %v472_v22  }
  0x79   : > { %485 = vperm.xlu1 %1574, %v471_v23  }
  0x86   : > { %v280_v24 = vpop.permute.xlu0 %279 }
  0x87   : > { %v278_v25 = vpop.permute.xlu1 %277 }
  0x88   : > { %v290_v29 = vsel %vm289_vm0, %v278_v25, %v280_v24 }
  0x8a   : > { %v1814_v26 = vpop.permute.xlu0 %281 }
  0x8b   : > { %v286_v27 = vpop.permute.xlu1 %285  ;;  %v291_v28 = vsel %vm289_vm0, %v280_v24, %v1814_v26 }
  0x8c   : > { %534 = vmatprep.subr.bf16.mxu0 %v291_v28 }
  0x8d   : > { %535 = vmatpush1.bf16.msra.mxu0 %v290_v29 }
  0x8e   : > { %v1819_v30 = vpop.permute.xlu0 %287 }
  0x8f   : > { %v284_v31 = vpop.permute.xlu1 %283  ;;  %v293_v32 = vsel %vm289_vm0, %v286_v27, %v1819_v30 }
  0x90   : > { %536 = vmatprep.subr.bf16.mxu0 %v293_v32  ;;  %v292_v33 = vsel %vm289_vm0, %v284_v31, %v286_v27 }
  0x91   : > { %537 = vmatpush1.bf16.msra.mxu0 %v292_v33 }
  0x92   : > { %v303_v34 = vpop.permute.xlu0 %302 }
  0x93   : > { %v1824_v35 = vpop.permute.xlu1 %304 }
  0x94   : > { %v314_v36 = vsel %vm312_vm1, %v303_v34, %v1824_v35 }
  0x95   : > { %538 = vmatprep.subr.bf16.mxu0 %v314_v36 }
  0x96   : > { %v301_v37 = vpop.permute.xlu0 %300 }
  0x97   : > { %v309_v38 = vpop.permute.xlu1 %308  ;;  %v313_v39 = vsel %vm312_vm1, %v301_v37, %v303_v34 }
  0x98   : > { %539 = vmatpush1.bf16.msra.mxu0 %v313_v39 }
  0x9a   : > { %v1829_v40 = vpop.permute.xlu0 %310 }
  0x9b   : > { %v307_v41 = vpop.permute.xlu1 %306  ;;  %v316_v42 = vsel %vm312_vm1, %v309_v38, %v1829_v40 }
  0x9c   : > { %540 = vmatprep.subr.bf16.mxu0 %v316_v42  ;;  %v315_v43 = vsel %vm312_vm1, %v307_v41, %v309_v38  ;;  %v1575_v42 = vld [vmem:[%s2146_s1] ss:$12 sps:$4 sm:$0xff]  }
  0x9d   : > { %541 = vmatpush1.bf16.msra.mxu0 %v315_v43 }
  0x9e   : > { %v326_v44 = vpop.permute.xlu0 %325 }
  0x9f   : > { %v1834_v45 = vpop.permute.xlu1 %327 }
  0xa0   : > { %v337_v46 = vsel %vm335_vm2, %v326_v44, %v1834_v45 }
  0xa1   : > { %542 = vmatprep.subr.bf16.mxu0 %v337_v46 }
  0xa2   : > { %v324_v47 = vpop.permute.xlu0 %323 }
  0xa3   : > { %v332_v48 = vpop.permute.xlu1 %331  ;;  %v336_v49 = vsel %vm335_vm2, %v324_v47, %v326_v44 }
  0xa4   : > { %543 = vmatpush1.bf16.msra.mxu0 %v336_v49 }
  0xa6   : > { %v1839_v50 = vpop.permute.xlu0 %333 }
  0xa7   : > { %v330_v51 = vpop.permute.xlu1 %329  ;;  %v339_v52 = vsel %vm335_vm2, %v332_v48, %v1839_v50 }
  0xa8   : > { %544 = vmatprep.subr.bf16.mxu0 %v339_v52  ;;  %v338_v53 = vsel %vm335_vm2, %v330_v51, %v332_v48  ;;  %v1580_v51 = vld [vmem:[%s2146_s1 + $0x18] ss:$12 sps:$4 sm:$0xff]  }
  0xa9   : > { %545 = vmatpush1.bf16.msra.mxu0 %v338_v53  ;;  %v1581_v53 = vld [vmem:[%s2146_s1 + $0x8] ss:$12 sps:$4 sm:$0xff]  }
  0xaa   : > { %v349_v54 = vpop.permute.xlu0 %348 }
  0xab   : > { %v351_v55 = vpop.permute.xlu1 %350 }
  0xac   : > { %v360_v56 = vsel %vm358_vm3, %v349_v54, %v351_v55  ;;  %1442 = vmatprep.subr.bf16.mxu1 %v351_v55 }
  0xad   : > { %546 = vmatprep.subr.bf16.mxu0 %v360_v56  ;;  %1443 = vmatpush3.bf16.msra.mxu1 %v1688_v10 }
  0xae   : > { %v347_v57 = vpop.permute.xlu0 %346 }
  0xaf   : > { %v355_v58 = vpop.permute.xlu1 %354  ;;  %v359_v59 = vsel %vm358_vm3, %v347_v57, %v349_v54  ;;  %v1582_v57 = vld [vmem:[%s2146_s1 + $0x20] ss:$12 sps:$4 sm:$0xff]  }
  0xb0   : > { %547 = vmatpush1.bf16.msra.mxu0 %v359_v59 }
  0xb2   : > { %v357_v60 = vpop.permute.xlu0 %356 }
  0xb3   : > { %v353_v61 = vpop.permute.xlu1 %352  ;;  %1444 = vmatprep.subr.bf16.mxu1 %v357_v60  ;;  %v362_v62 = vsel %vm358_vm3, %v355_v58, %v357_v60 }
  0xb4   : > { %548 = vmatprep.subr.bf16.mxu0 %v362_v62  ;;  %1445 = vmatpush3.bf16.msra.mxu1 %v1713_v17  ;;  %v361_v63 = vsel %vm358_vm3, %v353_v61, %v355_v58 }
  0xb5   : > { %549 = vmatpush1.bf16.msra.mxu0 %v361_v63 }
  0xb6   : > { %v372_v3 = vpop.permute.xlu0 %371 }
  0xb7   : > { %v374_v7 = vpop.permute.xlu1 %373 }
  0xb8   : > { %1446 = vmatprep.subr.bf16.mxu1 %v374_v7  ;;  %v383_v10 = vsel %vm381_vm4, %v372_v3, %v374_v7  ;;  %v748_v7 = vlaneseq }
  0xb9   : > { %550 = vmatprep.subr.bf16.mxu0 %v383_v10  ;;  %1447 = vmatpush3.bf16.msra.mxu1 %v1814_v26 }
  0xba   : > { %v370_v11 = vpop.permute.xlu0 %369 }
  0xbb   : > { %v378_v16 = vpop.permute.xlu1 %377  ;;  %v382_v18 = vsel %vm381_vm4, %v370_v11, %v372_v3 }
  0xbc   : > { %551 = vmatpush1.bf16.msra.mxu0 %v382_v18 }
  0xbe   : > { %v380_v20 = vpop.permute.xlu0 %379 }
  0xbf   : > { %v376_v21 = vpop.permute.xlu1 %375  ;;  %1448 = vmatprep.subr.bf16.mxu1 %v380_v20  ;;  %v385_v17 = vsel %vm381_vm4, %v378_v16, %v380_v20 }
  0xc0   : > { %552 = vmatprep.subr.bf16.mxu0 %v385_v17  ;;  %1449 = vmatpush3.bf16.msra.mxu1 %v1819_v30  ;;  %v384_v22 = vsel %vm381_vm4, %v376_v21, %v378_v16  ;;  %v749_v17 = vshrl.u32 %v748_v7, 7 }
  0xc1   : > { %553 = vmatpush1.bf16.msra.mxu0 %v384_v22 }
  0xc2   : > { %v395_v23 = vpop.permute.xlu0 %394 }
  0xc3   : > { %v397_v24 = vpop.permute.xlu1 %396 }
  0xc4   : > { %1450 = vmatprep.subr.bf16.mxu1 %v397_v24  ;;  %v406_v25 = vsel %vm404_vm5, %v395_v23, %v397_v24 }
  0xc5   : > { %554 = vmatprep.subr.bf16.mxu0 %v406_v25  ;;  %1451 = vmatpush3.bf16.msra.mxu1 %v1824_v35 }
  0xc6   : > { %v393_v26 = vpop.permute.xlu0 %392 }
  0xc7   : > { %v401_v27 = vpop.permute.xlu1 %400  ;;  %v405_v28 = vsel %vm404_vm5, %v393_v26, %v395_v23  ;;  %v758_v26 = vsub.s32 2, %v749_v17 }
  0xc8   : > { %555 = vmatpush1.bf16.msra.mxu0 %v405_v28  ;;  %v750_v28 = vsub.s32 0, %v749_v17 }
  0xca   : > { %v403_v29 = vpop.permute.xlu0 %402 }
  0xcb   : > { %v399_v31 = vpop.permute.xlu1 %398  ;;  %1452 = vmatprep.subr.bf16.mxu1 %v403_v29  ;;  %v408_v30 = vsel %vm404_vm5, %v401_v27, %v403_v29 }
  0xcc   : > { %556 = vmatprep.subr.bf16.mxu0 %v408_v30  ;;  %1453 = vmatpush3.bf16.msra.mxu1 %v1829_v40  ;;  %v407_v32 = vsel %vm404_vm5, %v399_v31, %v401_v27  ;;  %v746_v27 = vld [vmem:[%s2150_s5] sm:$0x7] }
  0xcd   : > { %557 = vmatpush1.bf16.msra.mxu0 %v407_v32 }
  0xce   : > { %v418_v33 = vpop.permute.xlu0 %417 }
  0xcf   : > { %v420_v34 = vpop.permute.xlu1 %419 }
  0xd0   : > { %1454 = vmatprep.subr.bf16.mxu1 %v420_v34  ;;  %v429_v35 = vsel %vm427_vm6, %v418_v33, %v420_v34  ;;  %v754_v34 = vsub.s32 1, %v749_v17 }
  0xd1   : > { %558 = vmatprep.subr.bf16.mxu0 %v429_v35  ;;  %1455 = vmatpush3.bf16.msra.mxu1 %v1834_v45  ;;  %v1578_v45 = vld [vmem:[%s2146_s1 + $0x1c] ss:$12 sps:$4 sm:$0xff]  }
  0xd2   : > { %v416_v36 = vpop.permute.xlu0 %415 }
  0xd3   : > { %v424_v37 = vpop.permute.xlu1 %423  ;;  %v428_v38 = vsel %vm427_vm6, %v416_v36, %v418_v33 }
  0xd4   : > { %559 = vmatpush1.bf16.msra.mxu0 %v428_v38  ;;  %v759_v38 = vrot.slane %v746_v27, %v758_v26 }
  0xd6   : > { %v426_v39 = vpop.permute.xlu0 %425 }
  0xd7   : > { %v422_v41 = vpop.permute.xlu1 %421  ;;  %1456 = vmatprep.subr.bf16.mxu1 %v426_v39  ;;  %v431_v40 = vsel %vm427_vm6, %v424_v37, %v426_v39 }
  0xd8   : > { %560 = vmatprep.subr.bf16.mxu0 %v431_v40  ;;  %1457 = vmatpush3.bf16.msra.mxu1 %v1839_v50  ;;  %v430_v43 = vsel %vm427_vm6, %v422_v41, %v424_v37 }
  0xd9   : > { %561 = vmatpush1.bf16.msra.mxu0 %v430_v43  ;;  %v751_v43 = vrot.slane %v746_v27, %v750_v28 }
  0xda   : > { %v441_v44 = vpop.permute.xlu0 %440 }
  0xdb   : > { %v443_v46 = vpop.permute.xlu1 %442  ;;  %669 = vmatmul.mubr.bf16.vlgmr.msra.gmra.mrb[0].mxu1 %v1575_v42 }
  0xdc   : > { %563 = vmatmul.mubr.bf16.vlgmr.msra.gmra.mrb[0].mxu0 %v1575_v42  ;;  %v452_v47 = vsel %vm450_vm7, %v441_v44, %v443_v46  ;;  %1506 = vmatprep.subr.bf16.mxu1 %v443_v46 }
  0xdd   : > { %583 = vmatprep.subr.bf16.mxu0 %v452_v47  ;;  %1507 = vmatpush3.bf16.msra.mxu1 %v443_v46 }
  0xde   : > { %v439_v48 = vpop.permute.xlu0 %438  ;;  %676 = vmatprep.mubr.bf16.mxu1 %v1578_v45  ;;  %572 = vmatprep.mubr.bf16.mxu0 %v1578_v45 }
  0xdf   : > { %v451_v49 = vsel %vm450_vm7, %v439_v48, %v441_v44  ;;  %v447_v50 = vpop.permute.xlu1 %446 }
  0xe0   : > { %584 = vmatpush1.bf16.msra.mxu0 %v451_v49 }
  0xe2   : > { %v449_v52 = vpop.permute.xlu0 %448 }
  0xe3   : > { %v445_v54 = vpop.permute.xlu1 %444  ;;  %677 = vmatmul.mubr.bf16.gmra.mrb[4].mxu1 %v1580_v51  ;;  %v454_v55 = vsel %vm450_vm7, %v447_v50, %v449_v52  ;;  %1508 = vmatprep.subr.bf16.mxu1 %v449_v52 }
  0xe4   : > { %v453_v56 = vsel %vm450_vm7, %v445_v54, %v447_v50  ;;  %573 = vmatmul.mubr.bf16.gmra.mrb[4].mxu0 %v1580_v51  ;;  %585 = vmatprep.subr.bf16.mxu0 %v454_v55  ;;  %v755_v54 = vrot.slane %v746_v27, %v754_v34 }
  0xe5   : > { %586 = vmatpush1.bf16.msra.mxu0 %v453_v56  ;;  %1509 = vmatpush3.bf16.msra.mxu1 %v449_v52 }
  0xe6   : > { %1510 = vmatprep.mubr.msk.bf16.mxu1 %vm523_vm8, %v1581_v53  ;;  %615 = vmatprep.mubr.bf16.mxu0 %v1606_v19 }
  0xeb   : > { %1511 = vmatmul.mubr.msk.bf16.vlgmr.msra.gmra.mrb[8].mxu1 %vm523_vm8, %v1582_v57 }
  0xec   : > { %1422 = vmatmul.mubr.msk.bf16.vlgmr.msra.gmra.mrb[0].mxu0 %vm523_vm8, %v1581_v53 }
  0xed   : > { %625 = vmatprep.mubr.bf16.mxu0 %v1606_v19 }
  0xf3   : > { %v476_v11 = vpop.permute.xlu0 %475 }
  0xf4   : > { %1423 = vmatmul.mubr.msk.bf16.gmra.mrb[4].mxu0 %vm523_vm8, %v1582_v57  ;;  %v481_v3 = vpop.permute.xlu1 %480 }
  0xf7   : > { %v491_v25 = vpop.permute.xlu0 %490 }
  0xf8   : > { %v486_v21 = vpop.permute.xlu1 %485 }
 0x1ae   : > { %v1458_v58 = vpop.f32.mrb[0].mxu1 }
 0x1af   : > { %v1459_v59 = vpop.f32.mrb[1].mxu1 }
 0x1b0   : > { %v1460_v60 = vadd.f32 %v1459_v59, %v1458_v58  ;;  %v1461_v61 = vpop.f32.mrb[2].mxu1 }
 0x1b1   : > { %v1462_v62 = vpop.f32.mrb[3].mxu1 }
 0x1b2   : > { %v1463_v63 = vadd.f32 %v1462_v62, %v1461_v61  ;;  %v671_v31 = vadd.f32 %v1460_v60, %v476_v11 }
 0x1b4   : > { %v674_v40 = vadd.f32 %v1463_v63, %v481_v3 }
 0x1b6   : > { %v1464_v10 = vpop.f32.mrb[4].mxu1 }
 0x1b7   : > { %v1465_v16 = vpop.f32.mrb[5].mxu1 }
 0x1b8   : > { %v1466_v18 = vadd.f32 %v1465_v16, %v1464_v10  ;;  %v1467_v20 = vpop.f32.mrb[6].mxu1 }
 0x1b9   : > { %v1468_v22 = vpop.f32.mrb[7].mxu1 }
 0x1ba   : > { %v1469_v23 = vadd.f32 %v1468_v22, %v1467_v20  ;;  %v679_v24 = vadd.f32 %v1466_v18, %v486_v21 }
 0x1bc   : > { %v682_v35 = vadd.f32 %v1469_v23, %v491_v25 }
 0x1be   : > { %v1512_v29 = vpop.f32.mrb[8].mxu1 }
 0x1bf   : > { %v728_v30 = vadd.f32 %v1512_v29, %v679_v24  ;;  %v617_v32 = vpop.f32.mrb[0].mxu0  ;;  %v719_v33 = vpop.f32.mrb[9].mxu1 }
 0x1c0   : > { %v1522_v36 = vadd.f32 %v617_v32, %v476_v11  ;;  %v720_v37 = vadd.f32 %v719_v33, %v671_v31  ;;  %v619_v39 = vpop.f32.mrb[1].mxu0  ;;  %v1513_v41 = vpop.f32.mrb[10].mxu1 }
 0x1c1   : > { %v742_v42 = vmax.f32 %v728_v30, 0.0  ;;  %v1523_v44 = vadd.f32 %v619_v39, %v476_v11  ;;  %v731_v45 = vadd.f32 %v1513_v41, %v682_v35  ;;  %v621_v46 = vpop.f32.mrb[2].mxu0  ;;  %v722_v47 = vpop.f32.mrb[11].mxu1 }
 0x1c2   : > { %v734_v48 = vmax.f32 %v1522_v36, 0.0  ;;  %v736_v49 = vmax.f32 %v720_v37, 0.0  ;;  %v1524_v50 = vadd.f32 %v621_v46, %v481_v3  ;;  %v723_v51 = vadd.f32 %v722_v47, %v674_v40  ;;  %v623_v52 = vpop.f32.mrb[3].mxu0 }
 0x1c3   : > { %v735_v53 = vmax.f32 %v1523_v44, 0.0  ;;  %v745_v55 = vmax.f32 %v731_v45, 0.0  ;;  %v1525_v56 = vadd.f32 %v623_v52, %v481_v3  ;;  %v771_v61 = vmul.f32 %v759_v38, %v742_v42 }
 0x1c4   : > { %v737_v57 = vmax.f32 %v1524_v50, 0.0  ;;  %v739_v58 = vmax.f32 %v723_v51, 0.0  ;;  %v763_v62 = vmul.f32 %v751_v43, %v734_v48  ;;  %v765_v63 = vmul.f32 %v759_v38, %v736_v49 }
 0x1c5   : > { %v774_v59 = vmul.f32 %v759_v38, %v745_v55  ;;  %v738_v60 = vmax.f32 %v1525_v56, 0.0  ;;  %v764_v11 = vmul.f32 %v755_v54, %v735_v53  ;;  %v1009_v55 = vld [vmem:[%s2149_s4] sm:$0xff]  ;;  %v1011_v56 = vld [vmem:[%s2149_s4 + $0x10] sm:$0xff] }
 0x1c6   : > { %v766_v7 = vmul.f32 %v751_v43, %v737_v57  ;;  %v768_v10 = vmul.f32 %v759_v38, %v739_v58  ;;  %v1010_v57 = vld [vmem:[%s2149_s4 + $0x8] sm:$0xff]  ;;  %v1012_v58 = vld [vmem:[%s2149_s4 + $0x18] sm:$0xff] }
 0x1c7   : > { %v767_v16 = vmul.f32 %v755_v54, %v738_v60  ;;  %v627_v18 = vpop.f32.mrb[4].mxu0  ;;  %v780_v20 = vpack.c.bf16 %v774_v59, %v771_v61 }
 0x1c8   : > { %v1526_v17 = vadd.f32 %v627_v18, %v486_v21  ;;  %v629_v22 = vpop.f32.mrb[5].mxu0  ;;  %v777_v23 = vpack.c.bf16 %v768_v10, %v765_v63  ;;  %v775_v24 = vpack.c.bf16 %v766_v7, %v763_v62 }
 0x1c9   : > { %v1527_v26 = vadd.f32 %v629_v22, %v486_v21  ;;  %v631_v27 = vpop.f32.mrb[6].mxu0  ;;  %v776_v3 = vpack.c.bf16 %v767_v16, %v764_v11 }
 0x1ca   : > { %v740_v28 = vmax.f32 %v1526_v17, 0.0  ;;  %v1528_v29 = vadd.f32 %v631_v27, %v491_v25  ;;  %791 = vrot.lane.b32.xlu0 %v777_v23, %s1608_s20  ;;  %v633_v31 = vpop.f32.mrb[7].mxu0  ;;  %787 = vrot.lane.b32.xlu1 %v775_v24, %s1608_s20 }
 0x1cb   : > { %v741_v30 = vmax.f32 %v1527_v26, 0.0  ;;  %v1529_v32 = vadd.f32 %v633_v31, %v491_v25 }
 0x1cc   : > { %v743_v33 = vmax.f32 %v1528_v29, 0.0  ;;  %v769_v35 = vmul.f32 %v751_v43, %v740_v28 }
 0x1cd   : > { %v744_v34 = vmax.f32 %v1529_v32, 0.0  ;;  %v770_v37 = vmul.f32 %v755_v54, %v741_v30 }
 0x1ce   : > { %v772_v36 = vmul.f32 %v751_v43, %v743_v33  ;;  %789 = vrot.lane.b32.xlu1 %v776_v3, %s1608_s20 }
 0x1cf   : > { %v773_v38 = vmul.f32 %v755_v54, %v744_v34  ;;  %v1585_v54 = vld [vmem:[%s2148_s3 + $0x4] ss:$12 sps:$4 sm:$0xff]  }
 0x1d0   : > { %v778_v39 = vpack.c.bf16 %v772_v36, %v769_v35  ;;  %1207 = vmatprep.mubr.bf16.mxu0 %v1585_v54  ;;  %1101 = vmatprep.mubr.bf16.mxu1 %v1585_v54 }
 0x1d1   : > { %v779_v41 = vpack.c.bf16 %v773_v38, %v770_v37 }
 0x1d2   : > { %797 = vrot.lane.b32.xlu1 %v780_v20, %s1608_s20 }
 0x1d3   : > { %795 = vrot.lane.b32.xlu0 %v779_v41, %s1608_s20 }
 0x1d7   : > { %793 = vrot.lane.b32.xlu0 %v778_v39, %s1608_s20 }
 0x23c   : > { %v788_v21 = vpop.permute.xlu1 %787  ;;  %v792_v25 = vpop.permute.xlu0 %791 }
 0x23d   : > { %v1897_v40 = vsel %vm799_vm9, 0, %v788_v21 }
 0x23e   : > { %825 = vrot.lane.b32.xlu1 %v1897_v40, %s1599_s27 }
 0x240   : > { %v790_v42 = vpop.permute.xlu1 %789 }
 0x241   : > { %v800_v44 = vsel %vm799_vm9, %v788_v21, %v790_v42  ;;  %v801_v45 = vsel %vm799_vm9, %v790_v42, %v792_v25 }
 0x242   : > { %v1909_v46 = vsel %vm814_vm10, %v801_v45, 0  ;;  %847 = vrot.lane.b32.xlu1 %v1897_v40, %s1600_s28  ;;  %1069 = vmatprep.subr.bf16.mxu1 %v800_v44 }
 0x243   : > { %829 = vrot.lane.b32.xlu0 %v1909_v46, %s1599_s27  ;;  %1433 = vmatpush1.bf16.msk.msra.mxu1 %vm1902_vm11, %v788_v21 }
 0x244   : > { %v798_v51 = vpop.permute.xlu1 %797 }
 0x245   : > { %v796_v47 = vpop.permute.xlu0 %795 }
 0x246   : > { %869 = vrot.lane.b32.xlu1 %v1897_v40, %s1601_s29  ;;  %v803_v52 = vsel %vm799_vm9, %v796_v47, %v798_v51 }
 0x247   : > { %851 = vrot.lane.b32.xlu0 %v1909_v46, %s1600_s28  ;;  %v1940_v53 = vsel %vm814_vm10, %v803_v52, 0 }
 0x249   : > { %v794_v48 = vpop.permute.xlu0 %793 }
 0x24a   : > { %v802_v49 = vsel %vm799_vm9, %v794_v48, %v796_v47  ;;  %891 = vrot.lane.b32.xlu1 %v1897_v40, %s1602_s30  ;;  %v812_v50 = vsel %vm799_vm9, 0, %v794_v48 }
 0x24b   : > { %873 = vrot.lane.b32.xlu0 %v1909_v46, %s1601_s29  ;;  %1071 = vmatprep.subr.bf16.mxu1 %v802_v49 }
 0x24c   : > { %1435 = vmatpush1.bf16.msk.msra.mxu1 %vm1902_vm11, %v794_v48 }
 0x24e   : > { %827 = vrot.lane.b32.xlu1 %v800_v44, %s1599_s27 }
 0x24f   : > { %895 = vrot.lane.b32.xlu0 %v1909_v46, %s1602_s30 }
 0x252   : > { %849 = vrot.lane.b32.xlu1 %v800_v44, %s1600_s28 }
 0x253   : > { %831 = vrot.lane.b32.xlu0 %v812_v50, %s1599_s27 }
 0x256   : > { %871 = vrot.lane.b32.xlu1 %v800_v44, %s1601_s29 }
 0x257   : > { %853 = vrot.lane.b32.xlu0 %v812_v50, %s1600_s28 }
 0x25a   : > { %893 = vrot.lane.b32.xlu1 %v800_v44, %s1602_s30 }
 0x25b   : > { %875 = vrot.lane.b32.xlu0 %v812_v50, %s1601_s29 }
 0x25e   : > { %835 = vrot.lane.b32.xlu1 %v1940_v53, %s1599_s27 }
 0x25f   : > { %833 = vrot.lane.b32.xlu0 %v802_v49, %s1599_s27 }
 0x262   : > { %915 = vrot.lane.b32.xlu1 %v800_v44, %s1603_s7 }
 0x263   : > { %897 = vrot.lane.b32.xlu0 %v812_v50, %s1602_s30 }
 0x266   : > { %857 = vrot.lane.b32.xlu1 %v1940_v53, %s1600_s28 }
 0x267   : > { %855 = vrot.lane.b32.xlu0 %v802_v49, %s1600_s28  ;;  %s2112_s28 = scalar_lea.vmem %s2151_s6, %s1554_s23 }
 0x26a   : > { %913 = vrot.lane.b32.xlu1 %v1897_v40, %s1603_s7 }
 0x26b   : > { %877 = vrot.lane.b32.xlu0 %v802_v49, %s1601_s29 }
 0x26e   : > { %879 = vrot.lane.b32.xlu1 %v1940_v53, %s1601_s29 }
 0x26f   : > { %899 = vrot.lane.b32.xlu0 %v802_v49, %s1602_s30 }
 0x272   : > { %937 = vrot.lane.b32.xlu1 %v800_v44, %s1604_s8 }
 0x273   : > { %917 = vrot.lane.b32.xlu0 %v1909_v46, %s1603_s7 }
 0x276   : > { %901 = vrot.lane.b32.xlu1 %v1940_v53, %s1602_s30 }
 0x277   : > { %921 = vrot.lane.b32.xlu0 %v802_v49, %s1603_s7 }
 0x27a   : > { %935 = vrot.lane.b32.xlu1 %v1897_v40, %s1604_s8 }
 0x27b   : > { %919 = vrot.lane.b32.xlu0 %v812_v50, %s1603_s7 }
 0x27e   : > { %923 = vrot.lane.b32.xlu1 %v1940_v53, %s1603_s7 }
 0x27f   : > { %939 = vrot.lane.b32.xlu0 %v1909_v46, %s1604_s8 }
 0x282   : > { %959 = vrot.lane.b32.xlu1 %v800_v44, %s1605_s11 }
 0x283   : > { %943 = vrot.lane.b32.xlu0 %v802_v49, %s1604_s8 }
 0x286   : > { %945 = vrot.lane.b32.xlu1 %v1940_v53, %s1604_s8 }
 0x287   : > { %941 = vrot.lane.b32.xlu0 %v812_v50, %s1604_s8 }
 0x28a   : > { %957 = vrot.lane.b32.xlu1 %v1897_v40, %s1605_s11 }
 0x28b   : > { %961 = vrot.lane.b32.xlu0 %v1909_v46, %s1605_s11 }
 0x28e   : > { %967 = vrot.lane.b32.xlu1 %v1940_v53, %s1605_s11 }
 0x28f   : > { %965 = vrot.lane.b32.xlu0 %v802_v49, %s1605_s11 }
 0x292   : > { %981 = vrot.lane.b32.xlu1 %v800_v44, %s1607_s12 }
 0x293   : > { %963 = vrot.lane.b32.xlu0 %v812_v50, %s1605_s11 }
 0x296   : > { %979 = vrot.lane.b32.xlu1 %v1897_v40, %s1607_s12 }
 0x297   : > { %983 = vrot.lane.b32.xlu0 %v1909_v46, %s1607_s12 }
 0x29a   : > { %989 = vrot.lane.b32.xlu1 %v1940_v53, %s1607_s12 }
 0x29b   : > { %987 = vrot.lane.b32.xlu0 %v802_v49, %s1607_s12 }
 0x29e   : > { %1015 = vperm.xlu1 %1574, %v1009_v55  }
 0x29f   : > { %985 = vrot.lane.b32.xlu0 %v812_v50, %s1607_s12 }
 0x2a2   : > { %1025 = vperm.xlu1 %1574, %v1011_v56  }
 0x2a3   : > { %1020 = vperm.xlu0 %1573, %v1010_v57  }
 0x2a6   : > { %1285 = vrot.lane.b32.xlu1 %v1664_v2, %s1602_s30 }
 0x2a7   : > { %1030 = vperm.xlu0 %1573, %v1012_v58  }
 0x2aa   : > { %1289 = vrot.lane.b32.xlu1 %v1672_v5, %s1602_s30 }
 0x2ab   : > { %1287 = vrot.lane.b32.xlu0 %v1660_v0, %s1602_s30 }
 0x2ae   : > { %1293 = vrot.lane.b32.xlu1 %v1662_v1, %s1602_s30 }
 0x2af   : > { %1291 = vrot.lane.b32.xlu0 %v1670_v4, %s1602_s30 }
 0x2b0   : > { %v826_v59 = vpop.permute.xlu1 %825 }
 0x2b2   : > { %1297 = vrot.lane.b32.xlu1 %v1694_v12, %s1602_s30 }
 0x2b3   : > { %1295 = vrot.lane.b32.xlu0 %v1674_v6, %s1602_s30 }
 0x2b4   : > { %v848_v2 = vpop.permute.xlu1 %847 }
 0x2b5   : > { %v2020_v60 = vpop.permute.xlu0 %829 }
 0x2b6   : > { %1301 = vrot.lane.b32.xlu1 %v1701_v14, %s1602_s30 }
 0x2b7   : > { %1299 = vrot.lane.b32.xlu0 %v1680_v8, %s1602_s30 }
 0x2b8   : > { %v870_v0 = vpop.permute.xlu1 %869 }
 0x2b9   : > { %v2026_v1 = vpop.permute.xlu0 %851 }
 0x2ba   : > { %1305 = vrot.lane.b32.xlu1 %v1682_v9, %s1602_s30 }
 0x2bb   : > { %1303 = vrot.lane.b32.xlu0 %v1696_v13, %s1602_s30 }
 0x2bc   : > { %v892_v4 = vpop.permute.xlu1 %891 }
 0x2bd   : > { %v2032_v5 = vpop.permute.xlu0 %873 }
 0x2bf   : > { %1307 = vrot.lane.b32.xlu0 %v1703_v15, %s1602_s30 }
 0x2c0   : > { %v828_v6 = vpop.permute.xlu1 %827 }
 0x2c1   : > { %v837_v12 = vsel %vm289_vm0, %v826_v59, %v828_v6  ;;  %v896_v14 = vpop.permute.xlu0 %895  ;;  %v838_v8 = vsel %vm289_vm0, %v828_v6, %v2020_v60  ;;  %v1586_v6 = vld [vmem:[%s2148_s3 + $0x1c] ss:$12 sps:$4 sm:$0xff]  }
 0x2c2   : > { %1073 = vmatprep.subr.bf16.mxu1 %v838_v8  ;;  %1474 = vmatprep.subr.bf16.mxu0 %v896_v14 }
 0x2c3   : > { %1074 = vmatpush1.bf16.msra.mxu1 %v837_v12  ;;  %1475 = vmatpush3.bf16.msra.mxu0 %v1909_v46 }
 0x2c4   : > { %v850_v9 = vpop.permute.xlu1 %849 }
 0x2c5   : > { %v832_v13 = vpop.permute.xlu0 %831  ;;  %v860_v20 = vsel %vm312_vm1, %v850_v9, %v2026_v1  ;;  %v859_v22 = vsel %vm312_vm1, %v848_v2, %v850_v9 }
 0x2c8   : > { %v872_v61 = vpop.permute.xlu1 %871 }
 0x2c9   : > { %v854_v62 = vpop.permute.xlu0 %853  ;;  %v882_v28 = vsel %vm335_vm2, %v872_v61, %v2032_v5  ;;  %v881_v31 = vsel %vm335_vm2, %v870_v0, %v872_v61  ;;  %v1588_v61 = vld [vmem:[%s2148_s3 + $0x18] ss:$12 sps:$4 sm:$0xff]  }
 0x2cc   : > { %v894_v63 = vpop.permute.xlu1 %893 }
 0x2cd   : > { %v876_v7 = vpop.permute.xlu0 %875  ;;  %v904_v36 = vsel %vm358_vm3, %v894_v63, %v896_v14  ;;  %v903_v38 = vsel %vm358_vm3, %v892_v4, %v894_v63  ;;  %v1583_v4 = vld [vmem:[%s2148_s3] ss:$12 sps:$4 sm:$0xff]  }
 0x2d0   : > { %v836_v10 = vpop.permute.xlu1 %835 }
 0x2d1   : > { %v834_v15 = vpop.permute.xlu0 %833 }
 0x2d2   : > { %v839_v11 = vsel %vm289_vm0, %v832_v13, %v834_v15  ;;  %v840_v16 = vsel %vm289_vm0, %v834_v15, %v836_v10 }
 0x2d3   : > { %1075 = vmatprep.subr.bf16.mxu1 %v840_v16 }
 0x2d4   : > { %1076 = vmatpush1.bf16.msra.mxu1 %v839_v11  ;;  %v916_v18 = vpop.permute.xlu1 %915 }
 0x2d5   : > { %v898_v17 = vpop.permute.xlu0 %897  ;;  %1077 = vmatprep.subr.bf16.mxu1 %v860_v20 }
 0x2d8   : > { %1078 = vmatpush1.bf16.msra.mxu1 %v859_v22  ;;  %v858_v23 = vpop.permute.xlu1 %857 }
 0x2d9   : > { %v856_v24 = vpop.permute.xlu0 %855 }
 0x2da   : > { %v861_v26 = vsel %vm312_vm1, %v854_v62, %v856_v24  ;;  %v862_v27 = vsel %vm312_vm1, %v856_v24, %v858_v23 }
 0x2db   : > { %1079 = vmatprep.subr.bf16.mxu1 %v862_v27 }
 0x2dc   : > { %1080 = vmatpush1.bf16.msra.mxu1 %v861_v26  ;;  %v914_v3 = vpop.permute.xlu1 %913 }
 0x2dd   : > { %v878_v29 = vpop.permute.xlu0 %877  ;;  %1081 = vmatprep.subr.bf16.mxu1 %v882_v28  ;;  %v925_v44 = vsel %vm381_vm4, %v914_v3, %v916_v18 }
 0x2de   : > { %v883_v34 = vsel %vm335_vm2, %v876_v7, %v878_v29  ;;  %v1589_v7 = vld [vmem:[%s2148_s3 + $0x8] ss:$12 sps:$4 sm:$0xff]  }
 0x2e0   : > { %1082 = vmatpush1.bf16.msra.mxu1 %v881_v31  ;;  %v2050_v30 = vpop.permute.xlu1 %879 }
 0x2e1   : > { %v900_v32 = vpop.permute.xlu0 %899  ;;  %v884_v33 = vsel %vm335_vm2, %v878_v29, %v2050_v30 }
 0x2e2   : > { %1083 = vmatprep.subr.bf16.mxu1 %v884_v33  ;;  %v905_v40 = vsel %vm358_vm3, %v898_v17, %v900_v32 }
 0x2e4   : > { %1084 = vmatpush1.bf16.msra.mxu1 %v883_v34  ;;  %v938_v35 = vpop.permute.xlu1 %937 }
 0x2e5   : > { %v918_v37 = vpop.permute.xlu0 %917  ;;  %1085 = vmatprep.subr.bf16.mxu1 %v904_v36 }
 0x2e6   : > { %v926_v42 = vsel %vm381_vm4, %v916_v18, %v918_v37  ;;  %v1590_v18 = vld [vmem:[%s2148_s3 + $0x20] ss:$12 sps:$4 sm:$0xff]  }
 0x2e8   : > { %1086 = vmatpush1.bf16.msra.mxu1 %v903_v38  ;;  %v902_v39 = vpop.permute.xlu1 %901 }
 0x2e9   : > { %v922_v41 = vpop.permute.xlu0 %921  ;;  %1476 = vmatprep.subr.bf16.mxu0 %v902_v39  ;;  %v906_v21 = vsel %vm358_vm3, %v900_v32, %v902_v39 }
 0x2ea   : > { %1087 = vmatprep.subr.bf16.mxu1 %v906_v21  ;;  %1477 = vmatpush3.bf16.msra.mxu0 %v1940_v53 }
 0x2eb   : > { %1478 = vmatprep.subr.bf16.mxu0 %v918_v37 }
 0x2ec   : > { %1088 = vmatpush1.bf16.msra.mxu1 %v905_v40  ;;  %v936_v25 = vpop.permute.xlu1 %935 }
 0x2ed   : > { %v920_v43 = vpop.permute.xlu0 %919  ;;  %1089 = vmatprep.subr.bf16.mxu1 %v926_v42  ;;  %v947_v52 = vsel %vm404_vm5, %v936_v25, %v938_v35 }
 0x2ee   : > { %1479 = vmatpush3.bf16.msra.mxu0 %v2020_v60  ;;  %v927_v48 = vsel %vm381_vm4, %v920_v43, %v922_v41 }
 0x2f0   : > { %1090 = vmatpush1.bf16.msra.mxu1 %v925_v44  ;;  %v924_v45 = vpop.permute.xlu1 %923 }
 0x2f1   : > { %v940_v46 = vpop.permute.xlu0 %939  ;;  %1480 = vmatprep.subr.bf16.mxu0 %v924_v45  ;;  %v928_v47 = vsel %vm381_vm4, %v922_v41, %v924_v45 }
 0x2f2   : > { %1091 = vmatprep.subr.bf16.mxu1 %v928_v47  ;;  %1481 = vmatpush3.bf16.msra.mxu0 %v836_v10  ;;  %v948_v50 = vsel %vm404_vm5, %v938_v35, %v940_v46 }
 0x2f3   : > { %1482 = vmatprep.subr.bf16.mxu0 %v940_v46 }
 0x2f4   : > { %1092 = vmatpush1.bf16.msra.mxu1 %v927_v48  ;;  %v960_v49 = vpop.permute.xlu1 %959 }
 0x2f5   : > { %v944_v51 = vpop.permute.xlu0 %943  ;;  %1093 = vmatprep.subr.bf16.mxu1 %v948_v50 }
 0x2f6   : > { %1483 = vmatpush3.bf16.msra.mxu0 %v2026_v1 }
 0x2f8   : > { %1094 = vmatpush1.bf16.msra.mxu1 %v947_v52  ;;  %v946_v53 = vpop.permute.xlu1 %945 }
 0x2f9   : > { %v942_v54 = vpop.permute.xlu0 %941  ;;  %1484 = vmatprep.subr.bf16.mxu0 %v946_v53  ;;  %v950_v55 = vsel %vm404_vm5, %v944_v51, %v946_v53 }
 0x2fa   : > { %v949_v56 = vsel %vm404_vm5, %v942_v54, %v944_v51  ;;  %1095 = vmatprep.subr.bf16.mxu1 %v950_v55  ;;  %1485 = vmatpush3.bf16.msra.mxu0 %v858_v23 }
 0x2fc   : > { %1096 = vmatpush1.bf16.msra.mxu1 %v949_v56  ;;  %v958_v57 = vpop.permute.xlu1 %957 }
 0x2fd   : > { %v962_v58 = vpop.permute.xlu0 %961  ;;  %v969_v2 = vsel %vm427_vm6, %v958_v57, %v960_v49 }
 0x2fe   : > { %1486 = vmatprep.subr.bf16.mxu0 %v962_v58  ;;  %v970_v59 = vsel %vm427_vm6, %v960_v49, %v962_v58 }
 0x2ff   : > { %1097 = vmatprep.subr.bf16.mxu1 %v970_v59  ;;  %1487 = vmatpush3.bf16.msra.mxu0 %v2032_v5 }
 0x300   : > { %1098 = vmatpush1.bf16.msra.mxu1 %v969_v2  ;;  %v968_v60 = vpop.permute.xlu1 %967 }
 0x301   : > { %v966_v0 = vpop.permute.xlu0 %965  ;;  %1488 = vmatprep.subr.bf16.mxu0 %v968_v60 }
 0x302   : > { %v972_v1 = vsel %vm427_vm6, %v966_v0, %v968_v60 }
 0x303   : > { %1099 = vmatprep.subr.bf16.mxu1 %v972_v1  ;;  %1489 = vmatpush3.bf16.msra.mxu0 %v2050_v30 }
 0x304   : > { %v982_v12 = vpop.permute.xlu1 %981 }
 0x305   : > { %v964_v14 = vpop.permute.xlu0 %963 }
 0x306   : > { %v971_v5 = vsel %vm427_vm6, %v964_v14, %v966_v0  ;;  %1208 = vmatmul.mubr.bf16.vlgmr.msra.gmra.mrb[8].mxu0 %v1583_v4 }
 0x307   : > { %1100 = vmatpush1.bf16.msra.mxu1 %v971_v5  ;;  %1215 = vmatprep.mubr.bf16.mxu0 %v1586_v6 }
 0x308   : > { %v980_v8 = vpop.permute.xlu1 %979 }
 0x309   : > { %v984_v9 = vpop.permute.xlu0 %983  ;;  %v991_v62 = vsel %vm450_vm7, %v980_v8, %v982_v12 }
 0x30a   : > { %1102 = vmatmul.mubr.bf16.vlgmr.msra.gmra.mrb[12].mxu1 %v1583_v4  ;;  %1514 = vmatprep.subr.bf16.mxu0 %v984_v9  ;;  %v992_v13 = vsel %vm450_vm7, %v982_v12, %v984_v9 }
 0x30b   : > { %1122 = vmatprep.subr.bf16.mxu1 %v992_v13  ;;  %1515 = vmatpush3.bf16.msra.mxu0 %v984_v9 }
 0x30c   : > { %1123 = vmatpush1.bf16.msra.mxu1 %v991_v62  ;;  %v990_v63 = vpop.permute.xlu1 %989  ;;  %1111 = vmatprep.mubr.bf16.mxu1 %v1586_v6 }
 0x30d   : > { %v988_v10 = vpop.permute.xlu0 %987  ;;  %1516 = vmatprep.subr.bf16.mxu0 %v990_v63 }
 0x30e   : > { %1216 = vmatmul.mubr.bf16.gmra.mrb[12].mxu0 %v1588_v61  ;;  %v994_v15 = vsel %vm450_vm7, %v988_v10, %v990_v63 }
 0x30f   : > { %1124 = vmatprep.subr.bf16.mxu1 %v994_v15  ;;  %1517 = vmatpush3.bf16.msra.mxu0 %v990_v63 }
 0x310   : > { %1518 = vmatprep.mubr.msk.bf16.mxu0 %vm523_vm8, %v1589_v7 }
 0x311   : > { %v986_v11 = vpop.permute.xlu0 %985 }
 0x312   : > { %v993_v16 = vsel %vm450_vm7, %v986_v11, %v988_v10  ;;  %1112 = vmatmul.mubr.bf16.gmra.mrb[16].mxu1 %v1588_v61 }
 0x313   : > { %1125 = vmatpush1.bf16.msra.mxu1 %v993_v16  ;;  %1154 = vmatprep.mubr.bf16.mxu1 %v1606_v19 }
 0x316   : > { %1519 = vmatmul.mubr.msk.bf16.vlgmr.msra.gmra.mrb[16].mxu0 %vm523_vm8, %v1590_v18 }
 0x31a   : > { %1436 = vmatmul.mubr.msk.bf16.vlgmr.msra.gmra.mrb[12].mxu1 %vm523_vm8, %v1589_v7 }
 0x31b   : > { %1164 = vmatprep.mubr.bf16.mxu1 %v1606_v19 }
 0x31d   : > { %v1016_v17 = vpop.permute.xlu1 %1015 }
 0x321   : > { %v2103_v23 = vpop.permute.xlu1 %1025 }
 0x322   : > { %1437 = vmatmul.mubr.msk.bf16.gmra.mrb[16].mxu1 %vm523_vm8, %v1590_v18  ;;  %v1021_v20 = vpop.permute.xlu0 %1020 }
 0x325   : > { %v1286_v26 = vpop.permute.xlu1 %1285 }
 0x326   : > { %v2101_v22 = vpop.permute.xlu0 %1030 }
 0x329   : > { %v1290_v3 = vpop.permute.xlu1 %1289 }
 0x32a   : > { %v1288_v24 = vpop.permute.xlu0 %1287 }
 0x32b   : > { %v1310_v0 = vsel %vm358_vm3, %v1286_v26, %v1288_v24  ;;  %v1311_v12 = vsel %vm358_vm3, %v1288_v24, %v1290_v3 }
 0x32d   : > { %v1294_v19 = vpop.permute.xlu1 %1293 }
 0x32e   : > { %v1292_v27 = vpop.permute.xlu0 %1291 }
 0x32f   : > { %v1312_v9 = vsel %vm358_vm3, %v1292_v27, %v1294_v19 }
 0x331   : > { %v1298_v41 = vpop.permute.xlu1 %1297 }
 0x332   : > { %v1296_v29 = vpop.permute.xlu0 %1295 }
 0x333   : > { %v1313_v62 = vsel %vm358_vm3, %v1294_v19, %v1296_v29 }
 0x335   : > { %v1302_v45 = vpop.permute.xlu1 %1301 }
 0x336   : > { %v1300_v35 = vpop.permute.xlu0 %1299 }
 0x337   : > { %v1314_v18 = vsel %vm358_vm3, %v1298_v41, %v1300_v35  ;;  %v1315_v24 = vsel %vm358_vm3, %v1300_v35, %v1302_v45 }
 0x339   : > { %v1306_v16 = vpop.permute.xlu1 %1305 }
 0x33a   : > { %v1304_v25 = vpop.permute.xlu0 %1303 }
 0x33e   : > { %v1308_v52 = vpop.permute.xlu0 %1307 }
 0x3d9   : > { %v1490_v28 = vpop.f32.mrb[8].mxu0 }
 0x3da   : > { %v1491_v31 = vpop.f32.mrb[9].mxu0 }
 0x3db   : > { %v1492_v30 = vadd.f32 %v1491_v31, %v1490_v28  ;;  %v1493_v32 = vpop.f32.mrb[10].mxu0  ;;  %v1317_v28 = vsel %vm358_vm3, %v1306_v16, %v1308_v52 }
 0x3dc   : > { %v1494_v33 = vpop.f32.mrb[11].mxu0 }
 0x3dd   : > { %v1495_v34 = vadd.f32 %v1494_v33, %v1493_v32  ;;  %v1210_v44 = vadd.f32 %v1492_v30, %v1016_v17  ;;  %v1316_v30 = vsel %vm358_vm3, %v1304_v25, %v1306_v16 }
 0x3df   : > { %v1213_v51 = vadd.f32 %v1495_v34, %v1021_v20 }
 0x3e1   : > { %v1496_v36 = vpop.f32.mrb[12].mxu0 }
 0x3e2   : > { %v1497_v37 = vpop.f32.mrb[13].mxu0 }
 0x3e3   : > { %v1498_v38 = vadd.f32 %v1497_v37, %v1496_v36  ;;  %v1499_v39 = vpop.f32.mrb[14].mxu0 }
 0x3e4   : > { %v1500_v21 = vpop.f32.mrb[15].mxu0 }
 0x3e5   : > { %v1501_v40 = vadd.f32 %v1500_v21, %v1499_v39  ;;  %v1218_v42 = vadd.f32 %v1498_v38, %v2103_v23 }
 0x3e7   : > { %v1221_v48 = vadd.f32 %v1501_v40, %v2101_v22 }
 0x3e9   : > { %v1520_v43 = vpop.f32.mrb[16].mxu0 }
 0x3ea   : > { %v1267_v46 = vadd.f32 %v1520_v43, %v1218_v42  ;;  %v1258_v47 = vpop.f32.mrb[17].mxu0 }
 0x3eb   : > { %v1259_v49 = vadd.f32 %v1258_v47, %v1210_v44  ;;  %v1521_v50 = vpop.f32.mrb[18].mxu0 }
 0x3ec   : > { %v1270_v53 = vadd.f32 %v1521_v50, %v1221_v48  ;;  %v1338_v54 = vadd.f32 %v1302_v45, %v1267_v46  ;;  %v1261_v55 = vpop.f32.mrb[19].mxu0 }
 0x3ed   : > { %v1332_v56 = vadd.f32 %v1290_v3, %v1259_v49  ;;  %v1262_v57 = vadd.f32 %v1261_v55, %v1213_v51  ;;  %v1156_v58 = vpop.f32.mrb[12].mxu1 }
 0x3ee   : > { %1350 = vst.msk [vmem:[%s2112_s28 + $0x40] sm:$0xff] %vm523_vm8, %v1338_v54  ;;  %v1341_v59 = vadd.f32 %v1308_v52, %v1270_v53  ;;  %v1530_v2 = vadd.f32 %v1156_v58, %v1016_v17  ;;  %v1158_v60 = vpop.f32.mrb[13].mxu1 }
 0x3ef   : > { %1344 = vst.msk [vmem:[%s2112_s28 + $0x10] sm:$0xff] %vm523_vm8, %v1332_v56  ;;  %v1335_v1 = vadd.f32 %v1296_v29, %v1262_v57  ;;  %v1531_v4 = vadd.f32 %v1158_v60, %v1016_v17  ;;  %v1160_v6 = vpop.f32.mrb[14].mxu1 }
 0x3f0   : > { %1353 = vst.msk [vmem:[%s2112_s28 + $0x58] sm:$0xff] %vm523_vm8, %v1341_v59  ;;  %v1330_v14 = vadd.f32 %v1530_v2, %v1310_v0  ;;  %v1532_v5 = vadd.f32 %v1160_v6, %v1021_v20  ;;  %v1162_v8 = vpop.f32.mrb[15].mxu1 }
 0x3f1   : > { %1347 = vst.msk [vmem:[%s2112_s28 + $0x28] sm:$0xff] %vm523_vm8, %v1335_v1  ;;  %v1331_v13 = vadd.f32 %v1531_v4, %v1311_v12  ;;  %v1533_v61 = vadd.f32 %v1162_v8, %v1021_v20 }
 0x3f2   : > { %1342 = vst [vmem:[%s2112_s28] sm:$0xff] %v1330_v14  ;;  %v1333_v63 = vadd.f32 %v1532_v5, %v1312_v9 }
 0x3f3   : > { %1343 = vst [vmem:[%s2112_s28 + $0x8] sm:$0xff] %v1331_v13  ;;  %v1334_v7 = vadd.f32 %v1533_v61, %v1313_v62 }
 0x3f4   : > { %1345 = vst [vmem:[%s2112_s28 + $0x18] sm:$0xff] %v1333_v63 }
 0x3f5   : > { %1346 = vst [vmem:[%s2112_s28 + $0x20] sm:$0xff] %v1334_v7  ;;  %v1166_v10 = vpop.f32.mrb[16].mxu1 }
 0x3f6   : > { %v1534_v15 = vadd.f32 %v1166_v10, %v2103_v23  ;;  %v1168_v11 = vpop.f32.mrb[17].mxu1 }
 0x3f7   : > { %v1535_v20 = vadd.f32 %v1168_v11, %v2103_v23  ;;  %v1170_v17 = vpop.f32.mrb[18].mxu1 }
 0x3f8   : > { %v1336_v26 = vadd.f32 %v1534_v15, %v1314_v18  ;;  %v1536_v27 = vadd.f32 %v1170_v17, %v2101_v22  ;;  %v1172_v3 = vpop.f32.mrb[19].mxu1 }
 0x3f9   : > { %v1337_v29 = vadd.f32 %v1535_v20, %v1315_v24  ;;  %v1537_v31 = vadd.f32 %v1172_v3, %v2101_v22 }
 0x3fa   : > { %1348 = vst [vmem:[%s2112_s28 + $0x30] sm:$0xff] %v1336_v26  ;;  %v1339_v32 = vadd.f32 %v1536_v27, %v1316_v30 }
 0x3fb   : > { %1349 = vst [vmem:[%s2112_s28 + $0x38] sm:$0xff] %v1337_v29  ;;  %v1340_v33 = vadd.f32 %v1537_v31, %v1317_v28 }
 0x3fc   : > { %1351 = vst [vmem:[%s2112_s28 + $0x48] sm:$0xff] %v1339_v32 }
 0x3fd   : > { %1352 = vst [vmem:[%s2112_s28 + $0x50] sm:$0xff] %v1340_v33 }
 0x3fe PF: > { %s16_s21 = sadd.s32 1, %s1597_s21  }
 0x3ff   : > { %p13_p4 = scmp.ge.s32.totalorder %s16_s21, 4  }
 0x401   :  { %15 = sbr.rel (!%p13_p4) target bundleno = 1 (0x1), region = 74 }

</bundles_post_ra>
